<compile_context>
chip_gen: v7x
topology: tpu7x:2x2x1
jax: 0.10.0
libtpu: 0.0.40
codegen_flags: <defaults>
</compile_context>

<pallas_src>
import functools

import jax
import jax.numpy as jnp
from jax import lax
from jax.experimental import pallas as pl
from jax.experimental.pallas import tpu as pltpu


def _encoder_kernel(img_ref, wconvT_ref, bconv_ref, pool_ref, wattr_ref,
                    battr_ref, feat_ref, attr_ref):
    """Fused per-block kernel (block_b images per grid step).

    img_ref    : (block_b, C_in, H*W)  channels-first, lane-dense pixels
    wconvT_ref : (D, C_in)             1x1-conv weight, transposed
    bconv_ref  : (D, 1)
    pool_ref   : (E*E, H*W)            adaptive-avg-pool matrix
    wattr_ref  : (D, A)                attribute head weight
    battr_ref  : (1, A)
    feat_ref   : (1, E*E, block_b*D)   pooled features, lane-dense slab
    attr_ref   : (1, block_b, A)       sigmoid(attribute logits)
    """
    block_b = img_ref.shape[0]
    c_in = img_ref.shape[1]
    d_model = wconvT_ref.shape[0]

    wT = wconvT_ref[...]                                  # (D, C_in)
    # Hoist the loop-invariant (D,1) lane-broadcast sources (JAX doesn't CSE
    # broadcast_in_dim inside loops).
    w_cols = [wT[:, c:c + 1] for c in range(c_in)]        # each (D, 1)
    bcol = bconv_ref[...]                                 # (D, 1)

    # 1x1 conv + ReLU as C_in VPU broadcast FMAs per image (no MXU for K=3).
    feats = []
    for b in range(block_b):                              # static unroll
        x = img_ref[b]                                    # (C_in, H*W)
        acc = w_cols[0] * x[0:1, :]                       # (D, H*W)
        for c in range(1, c_in):
            acc = acc + w_cols[c] * x[c:c + 1, :]
        feats.append(jnp.maximum(acc + bcol, 0.0))        # (D, H*W)
    featT_all = jnp.concatenate(feats, axis=0)            # (block_b*D, H*W)

    # Single fat MXU matmul: contract the pixel axis of both operands.
    # pooled[e, b*D + d] = avg over window e of feature d of image b.
    pooled = lax.dot_general(
        pool_ref[...], featT_all,
        dimension_numbers=(((1,), (1,)), ((), ())),
        preferred_element_type=jnp.float32)               # (E*E, block_b*D)
    feat_ref[0] = pooled.astype(feat_ref.dtype)           # 128-lane unmasked vst

    # Attribute head: global mean from the pooled bins (exact: equal windows),
    # then linear + sigmoid.
    g_all = jnp.mean(pooled, axis=0, keepdims=True)       # (1, block_b*D)
    g_rows = jnp.concatenate(
        [g_all[:, b * d_model:(b + 1) * d_model] for b in range(block_b)],
        axis=0)                                           # (block_b, D)
    logits = jnp.dot(g_rows, wattr_ref[...],
                     preferred_element_type=jnp.float32) + battr_ref[...]
    # exp on the EUP; the divide is on 64 elements (negligible, exact).
    attr_ref[0] = (1.0 / (1.0 + jnp.exp(-logits))).astype(attr_ref.dtype)


def _make_pool_matrix(h, w, e):
    """Adaptive avg-pool matrix for divisible H,W (matches AdaptiveAvgPool2d)."""
    assert h % e == 0 and w % e == 0
    kh, kw = h // e, w // e
    row_bin = jnp.arange(h) // kh                         # (h,)
    col_bin = jnp.arange(w) // kw                         # (w,)
    pix_bin = (row_bin[:, None] * e + col_bin[None, :]).reshape(-1)  # (h*w,)
    out_idx = jnp.arange(e * e)
    pool = (out_idx[:, None] == pix_bin[None, :]).astype(jnp.float32)
    return pool / float(kh * kw)                          # (e*e, h*w)


@functools.partial(jax.jit, static_argnames=("enc_size", "block_b"))
def future_and_attr_encoder(images_nchw, wconv, bconv, wattr, battr,
                            enc_size=4, block_b=4):
    """images_nchw: (B, C_in, H, W) float32. Returns (features NHWC, attrs)."""
    B, C_in, H, W = images_nchw.shape
    D = wconv.shape[1]
    A = wattr.shape[1]
    E = enc_size
    assert H % E == 0 and W % E == 0
    assert B % block_b == 0
    nb = B // block_b

    # Channels-first pixel-flattened view: a FREE contiguous reshape of NCHW
    # (no wrapper transpose pass over HBM).
    img_cf = images_nchw.reshape(B, C_in, H * W)
    pool = _make_pool_matrix(H, W, E)                     # (E*E, H*W)
    wconvT = jnp.transpose(wconv)                         # (D, C_in)  tiny
    bcol = bconv.reshape(D, 1)
    battr2 = battr.reshape(1, A)

    feat_blk, attr_blk = pl.pallas_call(
        _encoder_kernel,
        out_shape=(
            jax.ShapeDtypeStruct((nb, E * E, block_b * D), jnp.float32),
            jax.ShapeDtypeStruct((nb, block_b, A), jnp.float32),
        ),
        grid_spec=pltpu.PrefetchScalarGridSpec(
            num_scalar_prefetch=0,
            grid=(nb,),
            in_specs=[
                pl.BlockSpec((block_b, C_in, H * W), lambda i: (i, 0, 0)),
                pl.BlockSpec((D, C_in), lambda i: (0, 0)),
                pl.BlockSpec((D, 1), lambda i: (0, 0)),
                pl.BlockSpec((E * E, H * W), lambda i: (0, 0)),
                pl.BlockSpec((D, A), lambda i: (0, 0)),
                pl.BlockSpec((1, A), lambda i: (0, 0)),
            ],
            out_specs=[
                pl.BlockSpec((1, E * E, block_b * D), lambda i: (i, 0, 0)),
                pl.BlockSpec((1, block_b, A), lambda i: (i, 0, 0)),
            ],
        ),
        compiler_params=pltpu.CompilerParams(
            dimension_semantics=("parallel",)),
    )(img_cf, wconvT, bcol, pool, wattr, battr2)

    # Tiny output-side relayout (B*E*E*D floats) to NHWC, done once in XLA:
    # feat_blk[i, e, b*D + d] -> features[i*block_b + b, e1, e2, d]
    features = jnp.transpose(
        feat_blk.reshape(nb, E * E, block_b, D), (0, 2, 1, 3)
    ).reshape(B, E, E, D)
    attrs = attr_blk.reshape(B, A)
    return features, attrs


if __name__ == "__main__":
    # Small shapes consistent with the forward pass (3-channel images).
    B, C_in, H, W = 8, 3, 16, 16
    D = 32             # encoder_dim of the stand-in extractor
    A = 16             # number of attributes
    E = 4              # encoded_image_size (small stand-in for 14)
    BLOCK_B = 4        # images per grid step -> 128-lane output slab, 2 steps

    key = jax.random.PRNGKey(0)
    k_img, k_wc, k_bc, k_wa, k_ba = jax.random.split(key, 5)

    images = jax.random.normal(k_img, (B, C_in, H, W), dtype=jnp.float32)
    wconv = jax.random.normal(k_wc, (C_in, D), dtype=jnp.float32) * 0.1
    bconv = jax.random.normal(k_bc, (D,), dtype=jnp.float32) * 0.1
    wattr = jax.random.normal(k_wa, (D, A), dtype=jnp.float32) * 0.1
    battr = jax.random.normal(k_ba, (A,), dtype=jnp.float32) * 0.1

    features, attrs = future_and_attr_encoder(images, wconv, bconv, wattr,
                                              battr, enc_size=E,
                                              block_b=BLOCK_B)
    jax.block_until_ready((features, attrs))

    # Pure-JAX reference check.
    x_nhwc = jnp.transpose(images, (0, 2, 3, 1))
    feat_full = jnp.maximum(
        jnp.einsum("bhwc,cd->bhwd", x_nhwc, wconv) + bconv, 0.0)
    kh, kw = H // E, W // E
    pooled_ref = feat_full.reshape(B, E, kh, E, kw, D).mean(axis=(2, 4))
    attrs_ref = jax.nn.sigmoid(feat_full.mean(axis=(1, 2)) @ wattr + battr)

    assert features.shape == (B, E, E, D)
    assert attrs.shape == (B, A)
    assert jnp.allclose(features, pooled_ref, atol=1e-4, rtol=1e-4)
    assert jnp.allclose(attrs, attrs_ref, atol=1e-4, rtol=1e-4)

    print("KERNEL_OK")
</pallas_src>

<mosaic_0001>
module attributes {stable_mosaic.version = 11 : i64} {
  func.func @_encoder_kernel(%arg0: i32, %arg1: memref<4x3x256xf32, #tpu.memory_space<vmem>>, %arg2: memref<32x3xf32, #tpu.memory_space<vmem>>, %arg3: memref<32x1xf32, #tpu.memory_space<vmem>>, %arg4: memref<16x256xf32, #tpu.memory_space<vmem>>, %arg5: memref<32x16xf32, #tpu.memory_space<vmem>>, %arg6: memref<1x16xf32, #tpu.memory_space<vmem>>, %arg7: memref<1x16x128xf32, #tpu.memory_space<vmem>>, %arg8: memref<1x4x16xf32, #tpu.memory_space<vmem>>) attributes {dimension_semantics = [#tpu.dimension_semantics<parallel>], iteration_bounds = array<i64: 2>, scalar_prefetch = 0 : i64, scratch_operands = 0 : i64, tpu.core_type = #tpu.core_type<tc>, window_params = [{transform_indices = @transform_0, window_bounds = array<i64: 4, 3, 256>}, {pipeline_mode = #tpu.pipeline_mode<synchronous>, transform_indices = @transform_1, window_bounds = array<i64: 32, 3>}, {pipeline_mode = #tpu.pipeline_mode<synchronous>, transform_indices = @transform_2, window_bounds = array<i64: 32, 1>}, {pipeline_mode = #tpu.pipeline_mode<synchronous>, transform_indices = @transform_3, window_bounds = array<i64: 16, 256>}, {pipeline_mode = #tpu.pipeline_mode<synchronous>, transform_indices = @transform_4, window_bounds = array<i64: 32, 16>}, {pipeline_mode = #tpu.pipeline_mode<synchronous>, transform_indices = @transform_5, window_bounds = array<i64: 1, 16>}, {transform_indices = @transform_6, window_bounds = array<i64: 1, 16, 128>}, {transform_indices = @transform_7, window_bounds = array<i64: 1, 4, 16>}]} {
    %c0 = arith.constant 0 : index
    %c0_0 = arith.constant 0 : index
    %0 = vector.load %arg2[%c0, %c0_0] : memref<32x3xf32, #tpu.memory_space<vmem>>, vector<32x3xf32>
    %1 = vector.extract_strided_slice %0 {offsets = [0, 0], sizes = [32, 1], strides = [1, 1]} : vector<32x3xf32> to vector<32x1xf32>
    %2 = vector.extract_strided_slice %0 {offsets = [0, 1], sizes = [32, 1], strides = [1, 1]} : vector<32x3xf32> to vector<32x1xf32>
    %3 = vector.extract_strided_slice %0 {offsets = [0, 2], sizes = [32, 1], strides = [1, 1]} : vector<32x3xf32> to vector<32x1xf32>
    %c0_1 = arith.constant 0 : index
    %c0_2 = arith.constant 0 : index
    %4 = vector.load %arg3[%c0_1, %c0_2] : memref<32x1xf32, #tpu.memory_space<vmem>>, vector<32x1xf32>
    %c0_3 = arith.constant 0 : index
    %c0_4 = arith.constant 0 : index
    %c0_5 = arith.constant 0 : index
    %5 = vector.load %arg1[%c0_3, %c0_4, %c0_5] : memref<4x3x256xf32, #tpu.memory_space<vmem>>, vector<1x3x256xf32>
    %6 = vector.shape_cast %5 : vector<1x3x256xf32> to vector<3x256xf32>
    %7 = vector.extract_strided_slice %6 {offsets = [0, 0], sizes = [1, 256], strides = [1, 1]} : vector<3x256xf32> to vector<1x256xf32>
    %8 = vector.broadcast %1 : vector<32x1xf32> to vector<32x256xf32>
    %9 = vector.broadcast %7 : vector<1x256xf32> to vector<32x256xf32>
    %10 = arith.mulf %8, %9 : vector<32x256xf32>
    %11 = vector.extract_strided_slice %6 {offsets = [1, 0], sizes = [1, 256], strides = [1, 1]} : vector<3x256xf32> to vector<1x256xf32>
    %12 = vector.broadcast %2 : vector<32x1xf32> to vector<32x256xf32>
    %13 = vector.broadcast %11 : vector<1x256xf32> to vector<32x256xf32>
    %14 = arith.mulf %12, %13 : vector<32x256xf32>
    %15 = arith.addf %10, %14 : vector<32x256xf32>
    %16 = vector.extract_strided_slice %6 {offsets = [2, 0], sizes = [1, 256], strides = [1, 1]} : vector<3x256xf32> to vector<1x256xf32>
    %17 = vector.broadcast %3 : vector<32x1xf32> to vector<32x256xf32>
    %18 = vector.broadcast %16 : vector<1x256xf32> to vector<32x256xf32>
    %19 = arith.mulf %17, %18 : vector<32x256xf32>
    %20 = arith.addf %15, %19 : vector<32x256xf32>
    %21 = vector.broadcast %4 : vector<32x1xf32> to vector<32x256xf32>
    %22 = arith.addf %20, %21 : vector<32x256xf32>
    %cst = arith.constant 0.000000e+00 : f32
    %23 = vector.broadcast %cst : f32 to vector<32x256xf32>
    %24 = arith.maximumf %22, %23 : vector<32x256xf32>
    %c1 = arith.constant 1 : index
    %c0_6 = arith.constant 0 : index
    %c0_7 = arith.constant 0 : index
    %25 = vector.load %arg1[%c1, %c0_6, %c0_7] : memref<4x3x256xf32, #tpu.memory_space<vmem>>, vector<1x3x256xf32>
    %26 = vector.shape_cast %25 : vector<1x3x256xf32> to vector<3x256xf32>
    %27 = vector.extract_strided_slice %26 {offsets = [0, 0], sizes = [1, 256], strides = [1, 1]} : vector<3x256xf32> to vector<1x256xf32>
    %28 = vector.broadcast %1 : vector<32x1xf32> to vector<32x256xf32>
    %29 = vector.broadcast %27 : vector<1x256xf32> to vector<32x256xf32>
    %30 = arith.mulf %28, %29 : vector<32x256xf32>
    %31 = vector.extract_strided_slice %26 {offsets = [1, 0], sizes = [1, 256], strides = [1, 1]} : vector<3x256xf32> to vector<1x256xf32>
    %32 = vector.broadcast %2 : vector<32x1xf32> to vector<32x256xf32>
    %33 = vector.broadcast %31 : vector<1x256xf32> to vector<32x256xf32>
    %34 = arith.mulf %32, %33 : vector<32x256xf32>
    %35 = arith.addf %30, %34 : vector<32x256xf32>
    %36 = vector.extract_strided_slice %26 {offsets = [2, 0], sizes = [1, 256], strides = [1, 1]} : vector<3x256xf32> to vector<1x256xf32>
    %37 = vector.broadcast %3 : vector<32x1xf32> to vector<32x256xf32>
    %38 = vector.broadcast %36 : vector<1x256xf32> to vector<32x256xf32>
    %39 = arith.mulf %37, %38 : vector<32x256xf32>
    %40 = arith.addf %35, %39 : vector<32x256xf32>
    %41 = vector.broadcast %4 : vector<32x1xf32> to vector<32x256xf32>
    %42 = arith.addf %40, %41 : vector<32x256xf32>
    %cst_8 = arith.constant 0.000000e+00 : f32
    %43 = vector.broadcast %cst_8 : f32 to vector<32x256xf32>
    %44 = arith.maximumf %42, %43 : vector<32x256xf32>
    %c2 = arith.constant 2 : index
    %c0_9 = arith.constant 0 : index
    %c0_10 = arith.constant 0 : index
    %45 = vector.load %arg1[%c2, %c0_9, %c0_10] : memref<4x3x256xf32, #tpu.memory_space<vmem>>, vector<1x3x256xf32>
    %46 = vector.shape_cast %45 : vector<1x3x256xf32> to vector<3x256xf32>
    %47 = vector.extract_strided_slice %46 {offsets = [0, 0], sizes = [1, 256], strides = [1, 1]} : vector<3x256xf32> to vector<1x256xf32>
    %48 = vector.broadcast %1 : vector<32x1xf32> to vector<32x256xf32>
    %49 = vector.broadcast %47 : vector<1x256xf32> to vector<32x256xf32>
    %50 = arith.mulf %48, %49 : vector<32x256xf32>
    %51 = vector.extract_strided_slice %46 {offsets = [1, 0], sizes = [1, 256], strides = [1, 1]} : vector<3x256xf32> to vector<1x256xf32>
    %52 = vector.broadcast %2 : vector<32x1xf32> to vector<32x256xf32>
    %53 = vector.broadcast %51 : vector<1x256xf32> to vector<32x256xf32>
    %54 = arith.mulf %52, %53 : vector<32x256xf32>
    %55 = arith.addf %50, %54 : vector<32x256xf32>
    %56 = vector.extract_strided_slice %46 {offsets = [2, 0], sizes = [1, 256], strides = [1, 1]} : vector<3x256xf32> to vector<1x256xf32>
    %57 = vector.broadcast %3 : vector<32x1xf32> to vector<32x256xf32>
    %58 = vector.broadcast %56 : vector<1x256xf32> to vector<32x256xf32>
    %59 = arith.mulf %57, %58 : vector<32x256xf32>
    %60 = arith.addf %55, %59 : vector<32x256xf32>
    %61 = vector.broadcast %4 : vector<32x1xf32> to vector<32x256xf32>
    %62 = arith.addf %60, %61 : vector<32x256xf32>
    %cst_11 = arith.constant 0.000000e+00 : f32
    %63 = vector.broadcast %cst_11 : f32 to vector<32x256xf32>
    %64 = arith.maximumf %62, %63 : vector<32x256xf32>
    %c3 = arith.constant 3 : index
    %c0_12 = arith.constant 0 : index
    %c0_13 = arith.constant 0 : index
    %65 = vector.load %arg1[%c3, %c0_12, %c0_13] : memref<4x3x256xf32, #tpu.memory_space<vmem>>, vector<1x3x256xf32>
    %66 = vector.shape_cast %65 : vector<1x3x256xf32> to vector<3x256xf32>
    %67 = vector.extract_strided_slice %66 {offsets = [0, 0], sizes = [1, 256], strides = [1, 1]} : vector<3x256xf32> to vector<1x256xf32>
    %68 = vector.broadcast %1 : vector<32x1xf32> to vector<32x256xf32>
    %69 = vector.broadcast %67 : vector<1x256xf32> to vector<32x256xf32>
    %70 = arith.mulf %68, %69 : vector<32x256xf32>
    %71 = vector.extract_strided_slice %66 {offsets = [1, 0], sizes = [1, 256], strides = [1, 1]} : vector<3x256xf32> to vector<1x256xf32>
    %72 = vector.broadcast %2 : vector<32x1xf32> to vector<32x256xf32>
    %73 = vector.broadcast %71 : vector<1x256xf32> to vector<32x256xf32>
    %74 = arith.mulf %72, %73 : vector<32x256xf32>
    %75 = arith.addf %70, %74 : vector<32x256xf32>
    %76 = vector.extract_strided_slice %66 {offsets = [2, 0], sizes = [1, 256], strides = [1, 1]} : vector<3x256xf32> to vector<1x256xf32>
    %77 = vector.broadcast %3 : vector<32x1xf32> to vector<32x256xf32>
    %78 = vector.broadcast %76 : vector<1x256xf32> to vector<32x256xf32>
    %79 = arith.mulf %77, %78 : vector<32x256xf32>
    %80 = arith.addf %75, %79 : vector<32x256xf32>
    %81 = vector.broadcast %4 : vector<32x1xf32> to vector<32x256xf32>
    %82 = arith.addf %80, %81 : vector<32x256xf32>
    %cst_14 = arith.constant 0.000000e+00 : f32
    %83 = vector.broadcast %cst_14 : f32 to vector<32x256xf32>
    %84 = arith.maximumf %82, %83 : vector<32x256xf32>
    %85 = tpu.concatenate %24, %44, %64, %84 in 0 : vector<32x256xf32>, vector<32x256xf32>, vector<32x256xf32>, vector<32x256xf32> -> vector<128x256xf32>
    %c0_15 = arith.constant 0 : index
    %c0_16 = arith.constant 0 : index
    %86 = vector.load %arg4[%c0_15, %c0_16] : memref<16x256xf32, #tpu.memory_space<vmem>>, vector<16x256xf32>
    %cst_17 = arith.constant dense<0.000000e+00> : vector<16x128xf32>
    %87 = tpu.matmul %86, %85, %cst_17 {dimension_numbers = #tpu.dot_dimension_numbers<[1], [1], [0], [0], [0, 0, 1, 0], [], []>} : vector<16x256xf32>, vector<128x256xf32>, vector<16x128xf32> -> vector<16x128xf32>
    %c0_18 = arith.constant 0 : index
    %c0_19 = arith.constant 0 : index
    %c0_20 = arith.constant 0 : index
    %88 = vector.load %arg7[%c0_18, %c0_19, %c0_20] : memref<1x16x128xf32, #tpu.memory_space<vmem>>, vector<1x16x128xf32>
    %89 = vector.shape_cast %88 : vector<1x16x128xf32> to vector<16x128xf32>
    %90 = vector.shape_cast %87 : vector<16x128xf32> to vector<1x16x128xf32>
    tpu.vector_store %arg7[%c0_18, %c0_19, %c0_20], %90 {strides = array<i32>} : memref<1x16x128xf32, #tpu.memory_space<vmem>>, vector<1x16x128xf32>,
    %cst_21 = arith.constant dense<0.000000e+00> : vector<128xf32>
    %91 = vector.multi_reduction <add>, %87, %cst_21 [0] : vector<16x128xf32> to vector<128xf32>
    %92 = vector.shape_cast %91 : vector<128xf32> to vector<1x128xf32>
    %cst_22 = arith.constant 1.600000e+01 : f32
    %93 = vector.broadcast %cst_22 : f32 to vector<1x128xf32>
    %94 = arith.divf %92, %93 : vector<1x128xf32>
    %95 = vector.extract_strided_slice %94 {offsets = [0, 0], sizes = [1, 32], strides = [1, 1]} : vector<1x128xf32> to vector<1x32xf32>
    %96 = vector.extract_strided_slice %94 {offsets = [0, 32], sizes = [1, 32], strides = [1, 1]} : vector<1x128xf32> to vector<1x32xf32>
    %97 = vector.extract_strided_slice %94 {offsets = [0, 64], sizes = [1, 32], strides = [1, 1]} : vector<1x128xf32> to vector<1x32xf32>
    %98 = vector.extract_strided_slice %94 {offsets = [0, 96], sizes = [1, 32], strides = [1, 1]} : vector<1x128xf32> to vector<1x32xf32>
    %99 = tpu.concatenate %95, %96, %97, %98 in 0 : vector<1x32xf32>, vector<1x32xf32>, vector<1x32xf32>, vector<1x32xf32> -> vector<4x32xf32>
    %c0_23 = arith.constant 0 : index
    %c0_24 = arith.constant 0 : index
    %100 = vector.load %arg5[%c0_23, %c0_24] : memref<32x16xf32, #tpu.memory_space<vmem>>, vector<32x16xf32>
    %cst_25 = arith.constant dense<0.000000e+00> : vector<4x16xf32>
    %101 = tpu.matmul %99, %100, %cst_25 {dimension_numbers = #tpu.dot_dimension_numbers<[1], [0], [0], [1], [0, 0, 1, 1], [], []>} : vector<4x32xf32>, vector<32x16xf32>, vector<4x16xf32> -> vector<4x16xf32>
    %c0_26 = arith.constant 0 : index
    %c0_27 = arith.constant 0 : index
    %102 = vector.load %arg6[%c0_26, %c0_27] : memref<1x16xf32, #tpu.memory_space<vmem>>, vector<1x16xf32>
    %103 = vector.broadcast %102 : vector<1x16xf32> to vector<4x16xf32>
    %104 = arith.addf %101, %103 : vector<4x16xf32>
    %cst_28 = arith.constant 0.000000e+00 : f32
    %105 = vector.broadcast %cst_28 : f32 to vector<4x16xf32>
    %106 = arith.subf %105, %104 : vector<4x16xf32>
    %107 = math.exp %106 : vector<4x16xf32>
    %cst_29 = arith.constant 1.000000e+00 : f32
    %108 = vector.broadcast %cst_29 : f32 to vector<4x16xf32>
    %109 = arith.addf %108, %107 : vector<4x16xf32>
    %cst_30 = arith.constant 1.000000e+00 : f32
    %110 = vector.broadcast %cst_30 : f32 to vector<4x16xf32>
    %111 = arith.divf %110, %109 : vector<4x16xf32>
    %c0_31 = arith.constant 0 : index
    %c0_32 = arith.constant 0 : index
    %c0_33 = arith.constant 0 : index
    %112 = vector.load %arg8[%c0_31, %c0_32, %c0_33] : memref<1x4x16xf32, #tpu.memory_space<vmem>>, vector<1x4x16xf32>
    %113 = vector.shape_cast %112 : vector<1x4x16xf32> to vector<4x16xf32>
    %114 = vector.shape_cast %111 : vector<4x16xf32> to vector<1x4x16xf32>
    tpu.vector_store %arg8[%c0_31, %c0_32, %c0_33], %114 {strides = array<i32>} : memref<1x4x16xf32, #tpu.memory_space<vmem>>, vector<1x4x16xf32>,
    return
  }
  func.func @transform_0(%arg0: i32) -> (i32, i32, i32) {
    %c0_i32 = arith.constant 0 : i32
    %c0_i32_0 = arith.constant 0 : i32
    %c0_i32_1 = arith.constant 0 : i32
    return %arg0, %c0_i32, %c0_i32_0 : i32, i32, i32
  }
  func.func @transform_1(%arg0: i32) -> (i32, i32) {
    %c0_i32 = arith.constant 0 : i32
    %c0_i32_0 = arith.constant 0 : i32
    %c0_i32_1 = arith.constant 0 : i32
    return %c0_i32, %c0_i32_0 : i32, i32
  }
  func.func @transform_2(%arg0: i32) -> (i32, i32) {
    %c0_i32 = arith.constant 0 : i32
    %c0_i32_0 = arith.constant 0 : i32
    %c0_i32_1 = arith.constant 0 : i32
    return %c0_i32, %c0_i32_0 : i32, i32
  }
  func.func @transform_3(%arg0: i32) -> (i32, i32) {
    %c0_i32 = arith.constant 0 : i32
    %c0_i32_0 = arith.constant 0 : i32
    %c0_i32_1 = arith.constant 0 : i32
    return %c0_i32, %c0_i32_0 : i32, i32
  }
  func.func @transform_4(%arg0: i32) -> (i32, i32) {
    %c0_i32 = arith.constant 0 : i32
    %c0_i32_0 = arith.constant 0 : i32
    %c0_i32_1 = arith.constant 0 : i32
    return %c0_i32, %c0_i32_0 : i32, i32
  }
  func.func @transform_5(%arg0: i32) -> (i32, i32) {
    %c0_i32 = arith.constant 0 : i32
    %c0_i32_0 = arith.constant 0 : i32
    %c0_i32_1 = arith.constant 0 : i32
    return %c0_i32, %c0_i32_0 : i32, i32
  }
  func.func @transform_6(%arg0: i32) -> (i32, i32, i32) {
    %c0_i32 = arith.constant 0 : i32
    %c0_i32_0 = arith.constant 0 : i32
    %c0_i32_1 = arith.constant 0 : i32
    return %arg0, %c0_i32, %c0_i32_0 : i32, i32, i32
  }
  func.func @transform_7(%arg0: i32) -> (i32, i32, i32) {
    %c0_i32 = arith.constant 0 : i32
    %c0_i32_0 = arith.constant 0 : i32
    %c0_i32_1 = arith.constant 0 : i32
    return %arg0, %c0_i32, %c0_i32_0 : i32, i32, i32
  }
}

</mosaic_0001>

<bundles_post_ra>
// kernel: future_and_attr_encoder.1
= control target key start
LH: loop header
LB: loop body
LE: loop exit
PB: predicated region body
PF: predicated region fallthrough
CT: control target
= control target key end

     0   :  { %13 = vsyncpa [#allocation3], 0  ;;  %s1952_s0 = inlined_call_operand.vmem [shape: f32[8,3,256], index: 0, kind: input, shape index: {}]   ;;  %s1953_s1 = inlined_call_operand.vmem [shape: f32[32,3], index: 1, kind: input, shape index: {}]   ;;  %s1954_s2 = inlined_call_operand.vmem [shape: f32[32,1], index: 2, kind: input, shape index: {}]   ;;  %s1955_s3 = inlined_call_operand.vmem [shape: f32[16,256], index: 3, kind: input, shape index: {}]   ;;  %s1956_s4 = inlined_call_operand.vmem [shape: f32[32,16], index: 4, kind: input, shape index: {}]   ;;  %s1957_s5 = inlined_call_operand.vmem [shape: f32[1,16], index: 5, kind: input, shape index: {}]   ;;  %s1958_s6 = inlined_call_operand.vmem [shape: f32[2,16,128], index: 6, kind: output, shape index: {0}]   ;;  %s1959_s7 = inlined_call_operand.hbm [shape: f32[2,4,16], index: 7, kind: output, shape index: {1}]  }
   0x1   :  { %15 = vsyncpa [#allocation3 + $0x1], 0  ;;  %s1383_s24 = smov 0   ;;  %s1385_s25 = smov 0  }
   0x2   :  { %s1387_s26 = smov 0   ;;  %s1389_s27 = smov 0  }
   0x3 LB: > { %s1404_s28 = sadd.s32 4294967295, %s1331_s27   ;;  %s1131_s29 = sadd.s32 4294967294, %s1331_s27   ;;  %s1331_s27 = sphi %s1389_s27, %s1983_s27   ;;  %s1327_s26 = sphi %s1387_s26, %s1982_s26   ;;  %s1323_s25 = sphi %s1385_s25, %s1981_s25   ;;  %s1319_s24 = sphi %s1383_s24, %s1980_s24  }
   0x4   : > { %s1408_s30 = sadd.s32 1, %s1331_s27   ;;  %s185_s8 = sadd.s32 1, %s1327_s26 }
   0x5   : > { %s182_s9 = ssub.s32 %s1331_s27, %s1408_s30  ;;  %p195_p0 = scmp.ne.s32.totalorder %s1327_s26, %s1323_s25 }
   0x6   : > { %p183_p1 = scmp.eq.s32.totalorder %s182_s9, 0  ;;  %p196_p2 = scmp.eq.s32.totalorder %s1404_s28, 1 }
   0x7   : > { %p201_p3 = scmp.ne.s32.totalorder %s1323_s25, %s1319_s24  ;;  %p202_p4 = scmp.eq.s32.totalorder %s1131_s29, 1 }
   0x8   : > { %s1419_s10 = scalar_select %p183_p1, %s1327_s26, %s185_s8  }
   0x9   : > { %p1421_p5 = por %p196_p2, %p195_p0  ;;  %p1425_p6 = por %p202_p4, %p201_p3 }
   0xa   : > { %p1134_p7 = scmp.ge.s32.totalorder %s1331_s27, 1  ;;  %p245_p8 = scmp.lt.s32.totalorder %s1331_s27, 3 }
   0xc   : > { %p246_p9 = pnand %p1134_p7, %p245_p8 }
   0xe   : > { %249 = sbr.rel (%p246_p9) target bundleno = 862 (0x35e), region = 44 }
  0x15   : > { %v295_v0 = vld [vmem:[%s1953_s1] sm:$0xff]  ;;  %v1333_v1 = vmov 2   ;;  %v1334_v2 = vmov 1   ;;  %v296_v3 = vld [vmem:[%s1953_s1 + $0x8] sm:$0xff]  ;;  %v1335_v4 = vmov 0   ;;  %v297_v7 = vld [vmem:[%s1953_s1 + $0x10] sm:$0xff]  ;;  %v325_v12 = vlaneseq }
  0x16   : > { %1255 = vset.pattern.permute.xlu0 %v1333_v1  ;;  %1254 = vset.pattern.permute.xlu1 %v1334_v2  ;;  %v300_v5 = vld [vmem:[%s1954_s2 + $0x8] sm:$0xff]  ;;  %v299_v6 = vld [vmem:[%s1954_s2] sm:$0xff]  ;;  %v298_v8 = vld [vmem:[%s1953_s1 + $0x18] sm:$0xff]  ;;  %s1136_s17 = sshll.u32 %s1404_s28, 2  ;;  %p290_p11 = scmp.lt.s32.totalorder %s1404_s28, 1  ;;  %vm1337_vm0 = vmmov 0  }
  0x17   : > { %402 = vperm.xlu0 %1255, %v295_v0   ;;  %352 = vperm.xlu1 %1254, %v295_v0   ;;  %v301_v9 = vld [vmem:[%s1954_s2 + $0x10] sm:$0xff]  ;;  %v302_v10 = vld [vmem:[%s1954_s2 + $0x18] sm:$0xff]  ;;  %v827_v11 = vld [vmem:[%s1955_s3 + $0x8] sm:$0xff]  ;;  %p284_p10 = scmp.lt.s32.totalorder %s1136_s17, 7  ;;  %v326_v13 = vshrl.u32 %v325_v12, 7  ;;  %s1339_s13 = smov 64  }
  0x18   : > { %894 = vmatprep.mubr.f32.mxu0 %v827_v11  ;;  %s1340_s14 = smov 96   ;;  %s1341_s15 = smov 32   ;;  %vm926_vm1 = vcmask 1040384   ;;  %vm928_vm2 = vcmask 1041408   ;;  %vm930_vm3 = vcmask 1042432   ;;  %vm943_vm4 = vcmask 261120  }
  0x19   : > { %s1985_s17 = smov (!%p284_p10, %s1136_s17), 7  ;;  %v1464_v14 = vsub.s32 1, %v326_v13  ;;  %v1466_v15 = vsub.s32 2, %v326_v13  ;;  %v1471_v17 = vsub.s32 0, %v326_v13  ;;  %v1473_v18 = vsub.s32 4, %v326_v13  ;;  %s1147_s20 = sshll.u32 %s1404_s28, 6 }
  0x1a   : > { %s1150_s18 = sshll.u32 %s1985_s17, 3  ;;  %v1475_v19 = vsub.s32 5, %v326_v13  ;;  %v1482_v23 = vsub.s32 6, %v326_v13  ;;  %vm1023_vm5 = vcmask 125952   ;;  %s1910_s8 = scalar_lea.hbm %s1959_s7, %s1147_s20 }
  0x1b   : > { %1256 = vset.pattern.permute.xlu0 %v1335_v4  ;;  %356 = vperm.xlu1 %1254, %v296_v3   ;;  %s1462_s21 = scalar_lea.vmem %s1952_s0, %s1150_s18 }
  0x1c   : > { %306 = vperm.xlu0 %1256, %v295_v0   ;;  %v1469_v16 = vld [vmem:[%s1462_s21 + $0x18] sm:$0x77]  ;;  %v303_v20 = vld [vmem:[%s1462_s21] sm:$0x77]  ;;  %v1141_v44 = vld [vmem:[%s1462_s21 + $0x8] sm:$0x77] }
  0x1d   : > { %v745_v21 = vrot.slane %v1469_v16, %v1464_v14  ;;  %v779_v22 = vrot.slane %v1469_v16, %v1466_v15  ;;  %v332_v24 = vrot.slane %v303_v20, %v1473_v18  ;;  %v328_v25 = vrot.slane %v303_v20, %v1471_v17  ;;  %s291_s18 = scalar_select %p290_p11, %s1404_s28, 1 }
  0x1e   : > { %v374_v26 = vrot.slane %v303_v20, %v1475_v19  ;;  %v370_v27 = vrot.slane %v303_v20, %v1464_v14  ;;  %v424_v32 = vrot.slane %v303_v20, %v1482_v23  ;;  %v420_v33 = vrot.slane %v303_v20, %v1466_v15  ;;  %s1342_s28 = smov [#allocation2]  }
  0x1f   : > { %1257 = vset.pattern.permute.xlu1 %v1333_v1  ;;  %v1493_v30 = vrot.slane %v745_v21, %v1464_v14  ;;  %v1496_v31 = vrot.slane %v779_v22, %v1466_v15  ;;  %v1501_v34 = vrot.slane %v332_v24, %v1471_v17  ;;  %v1504_v35 = vrot.slane %v328_v25, %v1471_v17  ;;  %s1151_s19 = sshll.u32 %s291_s18, 4  ;;  %s280_s18 = sand.u32 1, %s1323_s25  }
  0x20   : > { %311 = vperm.xlu0 %1256, %v296_v3   ;;  %406 = vperm.xlu1 %1257, %v296_v3   ;;  %v1507_v36 = vrot.slane %v374_v26, %v1464_v14  ;;  %v1510_v37 = vrot.slane %v370_v27, %v1464_v14  ;;  %v1525_v42 = vrot.slane %v424_v32, %v1466_v15  ;;  %s294_s22 = scalar_lea.vmem %s1958_s6, %s1151_s19  ;;  %s1135_s19 = sshll.u32 %s280_s18, 2 }
  0x21   : > { %v1528_v43 = vrot.slane %v420_v33, %v1466_v15  ;;  %v497_v49 = vrot.slane %v1141_v44, %v1473_v18  ;;  %v523_v50 = vrot.slane %v1141_v44, %v1475_v19  ;;  %v557_v62 = vrot.slane %v1141_v44, %v1482_v23  ;;  %s1031_s9 = scalar_lea.sflag [#allocation3], %s280_s18 }
  0x22   : > { %v493_v63 = vrot.slane %v1141_v44, %v1471_v17 }
  0x23   : > { %v1558_v61 = vrot.slane %v497_v49, %v1471_v17  ;;  %v1574_v13 = vrot.slane %v523_v50, %v1464_v14  ;;  %v1584_v32 = vrot.slane %v557_v62, %v1466_v15  ;;  %v749_v62 = vrot.slane %v1469_v16, %v1475_v19 }
  0x24   : > { %458 = vperm.xlu0 %1256, %v300_v5   ;;  %1258 = vset.pattern.permute.xlu1 %v1335_v4  ;;  %v1587_v33 = vrot.slane %v493_v63, %v1471_v17  ;;  %v783_v63 = vrot.slane %v1469_v16, %v1482_v23 }
  0x25   : > { %453 = vperm.xlu1 %1258, %v299_v6  }
  0x28   : > { %1259 = vset.pattern.permute.xlu0 %v1334_v2 }
  0x29   : > { %360 = vperm.xlu0 %1259, %v297_v7   ;;  %316 = vperm.xlu1 %1258, %v297_v7  }
  0x2d   : > { %321 = vperm.xlu1 %1258, %v298_v8   ;;  %1262 = vset.pattern.permute.xlu0 %v1333_v1 }
  0x2e   : > { %414 = vperm.xlu0 %1262, %v298_v8  }
  0x31   : > { %1260 = vset.pattern.permute.xlu1 %v1334_v2 }
  0x32   : > { %364 = vperm.xlu1 %1260, %v298_v8   ;;  %1264 = vset.pattern.permute.xlu0 %v1335_v4  ;;  %v519_v8 = vrot.slane %v1141_v44, %v1464_v14 }
  0x36   : > { %1261 = vset.pattern.permute.xlu1 %v1333_v1 }
  0x37   : > { %410 = vperm.xlu1 %1261, %v297_v7  }
  0x3b   : > { %1263 = vset.pattern.permute.xlu1 %v1335_v4  ;;  %v1142_v4 = vld [vmem:[%s1462_s21 + $0x10] sm:$0x77]  ;;  %s282_s21 = scalar_lea.vmem [#allocation2], %s1135_s19 }
  0x3c   : > { %463 = vperm.xlu1 %1263, %v301_v9   ;;  %v553_v9 = vrot.slane %v1141_v44, %v1466_v15  ;;  %v610_v20 = vrot.slane %v1142_v4, %v1473_v18  ;;  %v636_v24 = vrot.slane %v1142_v4, %v1475_v19  ;;  %v632_v25 = vrot.slane %v1142_v4, %v1464_v14 }
  0x40   : > { %468 = vperm.xlu1 %1263, %v302_v10  }
  0x96   : > { %v1488_v28 = vpop.permute.xlu1 %352  ;;  %v1490_v29 = vpop.permute.xlu0 %402 }
  0x97   : > { %v1516_v39 = vmul.f32 %v1493_v30, %v1488_v28  ;;  %v1520_v40 = vmul.f32 %v1496_v31, %v1490_v29  ;;  %v386_v47 = vmul.f32 %v1507_v36, %v1488_v28  ;;  %v385_v48 = vmul.f32 %v1510_v37, %v1488_v28 }
  0x98   : > { %v436_v54 = vmul.f32 %v1525_v42, %v1490_v29  ;;  %v435_v56 = vmul.f32 %v1528_v43, %v1490_v29 }
  0x99   : > { %1968 = vst [vmem:[#allocation5_spill] sm:$0xff] %v1520_v40 }
  0x9a   : > { %v1512_v38 = vpop.permute.xlu1 %356 }
  0x9b   : > { %v1522_v41 = vpop.permute.xlu0 %306  ;;  %v388_v58 = vmul.f32 %v1507_v36, %v1512_v38  ;;  %v387_v60 = vmul.f32 %v1510_v37, %v1512_v38 }
  0x9c   : > { %v344_v45 = vmul.f32 %v1501_v34, %v1522_v41  ;;  %v343_v46 = vmul.f32 %v1504_v35, %v1522_v41 }
  0x9e   : > { %v394_v53 = vadd.f32 %v386_v47, %v344_v45  ;;  %v393_v55 = vadd.f32 %v385_v48, %v343_v46  ;;  %v1590_v46 = vrot.slane %v519_v8, %v1464_v14  ;;  %v1593_v47 = vrot.slane %v553_v9, %v1466_v15 }
  0x9f   : > { %v1541_v51 = vpop.permute.xlu0 %311  ;;  %v1543_v52 = vpop.permute.xlu1 %406  ;;  %v535_v8 = vmul.f32 %v1574_v13, %v1488_v28 }
  0xa0   : > { %v346_v57 = vmul.f32 %v1501_v34, %v1541_v51  ;;  %v345_v59 = vmul.f32 %v1504_v35, %v1541_v51  ;;  %v438_v1 = vmul.f32 %v1525_v42, %v1543_v52  ;;  %v437_v3 = vmul.f32 %v1528_v43, %v1543_v52 }
  0xa1   : > { %v444_v6 = vadd.f32 %v436_v54, %v394_v53  ;;  %v443_v7 = vadd.f32 %v435_v56, %v393_v55  ;;  %v670_v53 = vrot.slane %v1142_v4, %v1482_v23  ;;  %v606_v54 = vrot.slane %v1142_v4, %v1471_v17 }
  0xa2   : > { %v396_v0 = vadd.f32 %v388_v58, %v346_v57  ;;  %v395_v2 = vadd.f32 %v387_v60, %v345_v59  ;;  %v511_v55 = vmul.f32 %v1558_v61, %v1541_v51  ;;  %v1602_v56 = vrot.slane %v610_v20, %v1471_v17 }
  0xa3   : > { %v1567_v5 = vpop.permute.xlu0 %458  ;;  %v1605_v57 = vrot.slane %v636_v24, %v1464_v14  ;;  %v666_v58 = vrot.slane %v1142_v4, %v1466_v15  ;;  %v1624_v19 = vrot.slane %v670_v53, %v1466_v15  ;;  %v1627_v23 = vrot.slane %v606_v54, %v1471_v17 }
  0xa4   : > { %1969 = vst [vmem:[#allocation6_spill] sm:$0xff] %v1567_v5  ;;  %v1571_v10 = vpop.permute.xlu1 %453  ;;  %v446_v11 = vadd.f32 %v438_v1, %v396_v0  ;;  %v445_v12 = vadd.f32 %v437_v3, %v395_v2  ;;  %v509_v0 = vmul.f32 %v1558_v61, %v1522_v41  ;;  %v537_v1 = vmul.f32 %v1574_v13, %v1512_v38 }
  0xa5   : > { %v472_v21 = vadd.f32 %v1571_v10, %v444_v6  ;;  %v471_v22 = vadd.f32 %v1571_v10, %v443_v7  ;;  %v510_v2 = vmul.f32 %v1587_v33, %v1541_v51  ;;  %v1619_v3 = vrot.slane %v632_v25, %v1464_v14 }
  0xa6   : > { %v474_v26 = vadd.f32 %v1567_v5, %v446_v11  ;;  %v473_v27 = vadd.f32 %v1567_v5, %v445_v12  ;;  %v723_v6 = vrot.slane %v1469_v16, %v1473_v18  ;;  %v719_v7 = vrot.slane %v1469_v16, %v1471_v17 }
  0xa7   : > { %v480_v44 = vmax.f32 %v472_v21, 0.0  ;;  %v479_v45 = vmax.f32 %v471_v22, 0.0  ;;  %1970 = vst [vmem:[#allocation7_spill] sm:$0xff] %v1619_v3  ;;  %v545_v9 = vadd.f32 %v537_v1, %v511_v55  ;;  %v508_v11 = vmul.f32 %v1587_v33, %v1522_v41 }
  0xa8   : > { %v1595_v48 = vpop.permute.xlu1 %316  ;;  %v482_v49 = vmax.f32 %v474_v26, 0.0  ;;  %v481_v50 = vmax.f32 %v473_v27, 0.0  ;;  %v536_v12 = vmul.f32 %v1590_v46, %v1512_v38  ;;  %v569_v20 = vmul.f32 %v1584_v32, %v1490_v29 }
  0xa9   : > { %v1642_v21 = vrot.slane %v666_v58, %v1466_v15  ;;  %v1645_v18 = vrot.slane %v749_v62, %v1464_v14  ;;  %v1648_v16 = vrot.slane %v783_v63, %v1466_v15  ;;  %v543_v22 = vadd.f32 %v535_v8, %v509_v0 }
  0xaa   : > { %v1168_v59 = vpack.c.bf16 %v482_v49, %v480_v44  ;;  %v1170_v60 = vpack.c.bf16 %v481_v50, %v479_v45  ;;  %v571_v24 = vmul.f32 %v1584_v32, %v1543_v52  ;;  %v534_v25 = vmul.f32 %v1590_v46, %v1488_v28  ;;  %v1664_v45 = vpop.permute.xlu0 %360 }
  0xab   : > { %1971 = vst [vmem:[#allocation8_spill] sm:$0xff] %v1648_v16  ;;  %v544_v26 = vadd.f32 %v536_v12, %v510_v2  ;;  %v568_v27 = vmul.f32 %v1593_v47, %v1490_v29  ;;  %v648_v44 = vmul.f32 %v1605_v57, %v1488_v28  ;;  %v1659_v14 = vrot.slane %v723_v6, %v1471_v17 }
  0xac   : > { %v1621_v4 = vpop.permute.xlu1 %321  ;;  %1169 = vmatprep.subr.bf16.mxu0 %v1168_v59  ;;  %v1662_v15 = vrot.slane %v719_v7, %v1471_v17  ;;  %v579_v50 = vadd.f32 %v571_v24, %v545_v9  ;;  %v542_v53 = vadd.f32 %v534_v25, %v508_v11  ;;  %v570_v54 = vmul.f32 %v1593_v47, %v1543_v52 }
  0xad   : > { %1171 = vmatpush1.bf16.xpose.msra.mxu0 %v1170_v60  ;;  %v1672_v55 = vmul.f32 %v1624_v19, %v1490_v29  ;;  %v622_v58 = vmul.f32 %v1602_v56, %v1522_v41  ;;  %v647_v17 = vmul.f32 %v1619_v3, %v1488_v28  ;;  %v1680_v59 = vmul.f32 %v1642_v21, %v1490_v29 }
  0xae   : > { %v1684_v60 = vmul.f32 %v1645_v18, %v1488_v28  ;;  %v577_v62 = vadd.f32 %v569_v20, %v543_v22  ;;  %v578_v63 = vadd.f32 %v570_v54, %v544_v26  ;;  %v650_v0 = vmul.f32 %v1605_v57, %v1512_v38  ;;  %v1704_v12 = vpop.permute.xlu0 %414 }
  0xaf   : > { %1972 = vst [vmem:[#allocation9_spill] sm:$0xff] %v1680_v59  ;;  %v1690_v1 = vmul.f32 %v1648_v16, %v1490_v29  ;;  %v348_v2 = vmul.f32 %v1501_v34, %v1595_v48  ;;  %v390_v6 = vmul.f32 %v1507_v36, %v1664_v45  ;;  %v347_v7 = vmul.f32 %v1504_v35, %v1595_v48 }
  0xb0   : > { %v389_v28 = vmul.f32 %v1510_v37, %v1664_v45  ;;  %v585_v8 = vadd.f32 %v577_v62, %v1571_v10  ;;  %v587_v9 = vadd.f32 %v579_v50, %v1567_v5  ;;  %v576_v11 = vadd.f32 %v568_v27, %v542_v53 }
  0xb1   : > { %v1666_v49 = vpop.permute.xlu1 %364  ;;  %v621_v29 = vmul.f32 %v1627_v23, %v1522_v41  ;;  %v656_v25 = vadd.f32 %v648_v44, %v622_v58  ;;  %v1714_v26 = vmul.f32 %v1619_v3, %v1512_v38  ;;  %v586_v54 = vadd.f32 %v578_v63, %v1567_v5 }
  0xb2   : > { %v392_v22 = vmul.f32 %v1507_v36, %v1666_v49  ;;  %v391_v24 = vmul.f32 %v1510_v37, %v1666_v49  ;;  %v584_v53 = vadd.f32 %v576_v11, %v1571_v10  ;;  %v350_v36 = vmul.f32 %v1501_v34, %v1621_v4 }
  0xb3   : > { %1973 = vst [vmem:[#allocation10_spill] sm:$0xff] %v1714_v26  ;;  %v398_v62 = vadd.f32 %v390_v6, %v348_v2  ;;  %v349_v37 = vmul.f32 %v1504_v35, %v1621_v4  ;;  %v397_v44 = vadd.f32 %v389_v28, %v347_v7  ;;  %v442_v58 = vmul.f32 %v1525_v42, %v1704_v12 }
  0xb4   : > { %v441_v16 = vmul.f32 %v1528_v43, %v1704_v12  ;;  %v593_v3 = vmax.f32 %v585_v8, 0.0  ;;  %v595_v59 = vmax.f32 %v587_v9, 0.0  ;;  %v400_v40 = vadd.f32 %v392_v22, %v350_v36 }
  0xb5   : > { %v399_v26 = vadd.f32 %v391_v24, %v349_v37  ;;  %v592_v34 = vmax.f32 %v584_v53, 0.0  ;;  %v594_v2 = vmax.f32 %v586_v54, 0.0  ;;  %v1732_v6 = vadd.f32 %v647_v17, %v621_v29 }
  0xb6   : > { %v1706_v20 = vpop.permute.xlu1 %410  ;;  %v735_v35 = vmul.f32 %v1659_v14, %v1522_v41  ;;  %v684_v7 = vmul.f32 %v1624_v19, %v1543_v52  ;;  %v1744_v28 = vmul.f32 %v1645_v18, %v1512_v38  ;;  %v1176_v8 = vpack.c.bf16 %v595_v59, %v593_v3 }
  0xb7   : > { %v440_v27 = vmul.f32 %v1525_v42, %v1706_v20  ;;  %v439_v50 = vmul.f32 %v1528_v43, %v1706_v20  ;;  %v541_v42 = vmul.f32 %v1574_v13, %v1666_v49  ;;  %v624_v43 = vmul.f32 %v1602_v56, %v1541_v51 }
  0xb8   : > { %v513_v17 = vmul.f32 %v1558_v61, %v1595_v48  ;;  %v515_v9 = vmul.f32 %v1558_v61, %v1621_v4  ;;  %v539_v29 = vmul.f32 %v1574_v13, %v1664_v45  ;;  %v450_v22 = vadd.f32 %v442_v58, %v400_v40 }
  0xb9   : > { %v448_v11 = vadd.f32 %v440_v27, %v398_v62  ;;  %v447_v63 = vadd.f32 %v439_v50, %v397_v44  ;;  %v449_v27 = vadd.f32 %v441_v16, %v399_v26  ;;  %v1756_v54 = vpack.c.bf16 %v594_v2, %v592_v34 }
  0xba   : > { %v575_v3 = vmul.f32 %v1584_v32, %v1704_v12  ;;  %v512_v59 = vmul.f32 %v1587_v33, %v1595_v48  ;;  %v538_v61 = vmul.f32 %v1590_v46, %v1664_v45  ;;  %v549_v16 = vadd.f32 %v541_v42, %v515_v9 }
  0xbb   : > { %v1730_v5 = vpop.permute.xlu1 %463  ;;  %v573_v26 = vmul.f32 %v1584_v32, %v1706_v20  ;;  %v547_v36 = vadd.f32 %v539_v29, %v513_v17  ;;  %v514_v62 = vmul.f32 %v1587_v33, %v1621_v4  ;;  %v540_v37 = vmul.f32 %v1590_v46, %v1666_v49 }
  0xbc   : > { %v476_v24 = vadd.f32 %v1730_v5, %v448_v11  ;;  %v475_v50 = vadd.f32 %v1730_v5, %v447_v63  ;;  %v658_v44 = vadd.f32 %v650_v0, %v624_v43  ;;  %v546_v2 = vadd.f32 %v538_v61, %v512_v59 }
  0xbd   : > { %v690_v42 = vadd.f32 %v1672_v55, %v656_v25  ;;  %v623_v32 = vmul.f32 %v1627_v23, %v1541_v51  ;;  %v581_v33 = vadd.f32 %v573_v26, %v547_v36  ;;  %v583_v29 = vadd.f32 %v575_v3, %v549_v16 }
  0xbe   : > { %v484_v58 = vmax.f32 %v476_v24, 0.0  ;;  %v483_v63 = vmax.f32 %v475_v50, 0.0  ;;  %v692_v46 = vadd.f32 %v684_v7, %v658_v44  ;;  %v683_v0 = vmul.f32 %v1642_v21, %v1543_v52 }
  0xbf   : > { %v1754_v53 = vpop.permute.xlu1 %468  ;;  %v769_v43 = vadd.f32 %v1684_v60, %v735_v35  ;;  %v734_v55 = vmul.f32 %v1662_v15, %v1522_v41  ;;  %v736_v25 = vmul.f32 %v1662_v15, %v1541_v51  ;;  %v762_v50 = vmul.f32 %v1493_v30, %v1512_v38 }
  0xc0   : > { %v478_v40 = vadd.f32 %v1754_v53, %v450_v22  ;;  %v477_v13 = vadd.f32 %v1754_v53, %v449_v27  ;;  %v574_v22 = vmul.f32 %v1593_v47, %v1704_v12  ;;  %v548_v27 = vadd.f32 %v540_v37, %v514_v62  ;;  %v1976_v62 = vld [vmem:[#allocation5_spill] sm:$0xff] }
  0xc1   : > { %v591_v24 = vadd.f32 %v583_v29, %v1754_v53  ;;  %v572_v7 = vmul.f32 %v1593_v47, %v1706_v20  ;;  %v654_v3 = vmul.f32 %v1605_v57, %v1666_v49  ;;  %v1792_v60 = vadd.f32 %v1690_v1, %v769_v43 }
  0xc2   : > { %v486_v11 = vmax.f32 %v478_v40, 0.0  ;;  %v485_v34 = vmax.f32 %v477_v13, 0.0  ;;  %v796_v35 = vmul.f32 %v1496_v31, %v1543_v52  ;;  %v589_v41 = vadd.f32 %v581_v33, %v1730_v5  ;;  %v1974_v40 = vld [vmem:[#allocation6_spill] sm:$0xff] }
  0xc3   : > { %v626_v59 = vmul.f32 %v1602_v56, %v1595_v48  ;;  %v768_v38 = vadd.f32 %v1516_v39, %v734_v55  ;;  %v770_v61 = vadd.f32 %v762_v50, %v736_v25  ;;  %v698_v47 = vadd.f32 %v690_v42, %v1571_v10  ;;  %v1977_v55 = vld [vmem:[#allocation9_spill] sm:$0xff] }
  0xc4   : > { %v1172_v17 = vpack.c.bf16 %v486_v11, %v484_v58  ;;  %v1174_v9 = vpack.c.bf16 %v485_v34, %v483_v63  ;;  %v700_v13 = vadd.f32 %v692_v46, %v1974_v40  ;;  %v628_v1 = vmul.f32 %v1602_v56, %v1621_v4 }
  0xc5   : > { %v652_v16 = vmul.f32 %v1605_v57, %v1664_v45  ;;  %v599_v26 = vmax.f32 %v591_v24, 0.0  ;;  %v802_v37 = vadd.f32 %v1976_v62, %v768_v38  ;;  %v804_v44 = vadd.f32 %v796_v35, %v770_v61  ;;  %v1978_v61 = vld [vmem:[#allocation7_spill] sm:$0xff] }
  0xc6   : > { %1173 = vmatprep.subr.bf16.mxu0 %v1172_v17  ;;  %v580_v58 = vadd.f32 %v572_v7, %v546_v2  ;;  %v582_v11 = vadd.f32 %v574_v22, %v548_v27  ;;  %v662_v39 = vadd.f32 %v654_v3, %v628_v1  ;;  %v738_v63 = vmul.f32 %v1662_v15, %v1595_v48 }
  0xc7   : > { %1175 = vmatpush1.bf16.xpose.msra.mxu0 %v1174_v9  ;;  %v597_v34 = vmax.f32 %v589_v41, 0.0  ;;  %v686_v42 = vmul.f32 %v1624_v19, %v1706_v20  ;;  %v810_v56 = vadd.f32 %v802_v37, %v1571_v10  ;;  %v812_v57 = vadd.f32 %v804_v44, %v1974_v40 }
  0xc8   : > { %1177 = vmatprep.subr.bf16.mxu0 %v1176_v8  ;;  %v1975_v8 = vld [vmem:[#allocation10_spill] sm:$0xff]  ;;  %v590_v17 = vadd.f32 %v582_v11, %v1754_v53  ;;  %v764_v2 = vmul.f32 %v1493_v30, %v1664_v45  ;;  %v766_v22 = vmul.f32 %v1493_v30, %v1666_v49  ;;  %v798_v27 = vmul.f32 %v1496_v31, %v1706_v20 }
  0xc9   : > { %v657_v36 = vadd.f32 %v1975_v8, %v623_v32  ;;  %v740_v32 = vmul.f32 %v1662_v15, %v1621_v4  ;;  %v1180_v9 = vpack.c.bf16 %v599_v26, %v597_v34  ;;  %v818_v33 = vmax.f32 %v810_v56, 0.0 }
  0xca   : > { %v820_v29 = vmax.f32 %v812_v57, 0.0  ;;  %v588_v46 = vadd.f32 %v580_v58, %v1730_v5  ;;  %v688_v43 = vmul.f32 %v1624_v19, %v1704_v12  ;;  %v772_v15 = vadd.f32 %v764_v2, %v738_v63 }
  0xcb   : > { %v774_v24 = vadd.f32 %v766_v22, %v740_v32  ;;  %v689_v25 = vadd.f32 %v1977_v55, %v1732_v6  ;;  %v691_v30 = vadd.f32 %v683_v0, %v657_v36  ;;  %v800_v7 = vmul.f32 %v1496_v31, %v1704_v12 }
  0xcc   : > { %v1829_v50 = vpack.c.bf16 %v820_v29, %v818_v33  ;;  %v598_v3 = vmax.f32 %v590_v17, 0.0  ;;  %v706_v35 = vmax.f32 %v698_v47, 0.0  ;;  %v806_v41 = vadd.f32 %v798_v27, %v772_v15 }
  0xcd   : > { %v708_v38 = vmax.f32 %v700_v13, 0.0  ;;  %v653_v19 = vmul.f32 %v1978_v61, %v1666_v49  ;;  %v737_v1 = vmul.f32 %v1659_v14, %v1541_v51  ;;  %v808_v26 = vadd.f32 %v800_v7, %v774_v24 }
  0xce   : > { %v596_v8 = vmax.f32 %v588_v46, 0.0  ;;  %v696_v0 = vadd.f32 %v688_v43, %v662_v39  ;;  %v814_v36 = vadd.f32 %v806_v41, %v1730_v5  ;;  %v697_v62 = vadd.f32 %v689_v25, %v1571_v10 }
  0xcf   : > { %1179 = vmatpush1.bf16.xpose.msra.mxu0 %v1756_v54  ;;  %v660_v54 = vadd.f32 %v652_v16, %v626_v59  ;;  %v699_v31 = vadd.f32 %v691_v30, %v1974_v40  ;;  %v625_v59 = vmul.f32 %v1627_v23, %v1595_v48  ;;  %v816_v47 = vadd.f32 %v808_v26, %v1754_v53 }
  0xd0   : > { %1181 = vmatprep.subr.bf16.mxu0 %v1180_v9  ;;  %v1182_v13 = vpack.c.bf16 %v598_v3, %v596_v8  ;;  %v704_v16 = vadd.f32 %v696_v0, %v1754_v53  ;;  %v627_v51 = vmul.f32 %v1627_v23, %v1621_v4  ;;  %v651_v37 = vmul.f32 %v1978_v61, %v1664_v45  ;;  %v1979_v23 = vld [vmem:[#allocation8_spill] sm:$0xff] }
  0xd1   : > { %v694_v6 = vadd.f32 %v686_v42, %v660_v54  ;;  %v1184_v44 = vpack.c.bf16 %v708_v38, %v706_v35  ;;  %v771_v58 = vadd.f32 %v1744_v28, %v737_v1  ;;  %v822_v11 = vmax.f32 %v814_v36, 0.0  ;;  %v933_v1 = vld [vmem:[%s1956_s4 + $0x8] sm:$0xff] }
  0xd2   : > { %v824_v39 = vmax.f32 %v816_v47, 0.0  ;;  %v661_v34 = vadd.f32 %v653_v19, %v627_v51  ;;  %v685_v42 = vmul.f32 %v1642_v21, %v1706_v20  ;;  %v687_v56 = vmul.f32 %v1642_v21, %v1704_v12  ;;  %v934_v47 = vld [vmem:[%s1956_s4 + $0x10] sm:$0xff] }
  0xd3   : > { %v702_v63 = vadd.f32 %v694_v6, %v1730_v5  ;;  %v797_v57 = vmul.f32 %v1979_v23, %v1543_v52  ;;  %v705_v32 = vmax.f32 %v697_v62, 0.0  ;;  %v707_v2 = vmax.f32 %v699_v31, 0.0 }
  0xd4   : > { %v1198_v17 = vpack.c.bf16 %v824_v39, %v822_v11  ;;  %v712_v28 = vmax.f32 %v704_v16, 0.0  ;;  %v659_v22 = vadd.f32 %v651_v37, %v625_v59  ;;  %v695_v27 = vadd.f32 %v687_v56, %v661_v34 }
  0xd5   : > { %v805_v9 = vadd.f32 %v797_v57, %v771_v58  ;;  %v710_v33 = vmax.f32 %v702_v63, 0.0  ;;  %v767_v46 = vmul.f32 %v1645_v18, %v1666_v49  ;;  %v1186_v43 = vpack.c.bf16 %v707_v2, %v705_v32  ;;  %v1144_v32 = vld [vmem:[%s1957_s5] ss:$0 sm:$0xff] }
  0xd6   : > { %v693_v29 = vadd.f32 %v685_v42, %v659_v22  ;;  %v703_v21 = vadd.f32 %v695_v27, %v1754_v53  ;;  %v739_v24 = vmul.f32 %v1659_v14, %v1595_v48  ;;  %v811_v52 = vadd.f32 %v1792_v60, %v1571_v10 }
  0xd7   : > { %1183 = vmatpush1.bf16.xpose.msra.mxu0 %v1182_v13  ;;  %v1188_v15 = vpack.c.bf16 %v712_v28, %v710_v33  ;;  %v813_v55 = vadd.f32 %v805_v9, %v1974_v40  ;;  %v741_v25 = vmul.f32 %v1659_v14, %v1621_v4  ;;  %v765_v30 = vmul.f32 %v1645_v18, %v1664_v45  ;;  %v935_v13 = vld [vmem:[%s1956_s4 + $0x18] sm:$0xff] }
  0xd8   : > { %1185 = vmatprep.subr.bf16.mxu0 %v1184_v44  ;;  %v701_v49 = vadd.f32 %v693_v29, %v1730_v5  ;;  %v799_v3 = vmul.f32 %v1979_v23, %v1706_v20  ;;  %v801_v48 = vmul.f32 %v1979_v23, %v1704_v12  ;;  %v711_v10 = vmax.f32 %v703_v21, 0.0  ;;  %v826_v12 = vld [vmem:[%s1955_s3] sm:$0xff] }
  0xd9   : > { %v775_v7 = vadd.f32 %v767_v46, %v741_v25  ;;  %v819_v60 = vmax.f32 %v811_v52, 0.0  ;;  %v821_v40 = vmax.f32 %v813_v55, 0.0  ;;  %v773_v35 = vadd.f32 %v765_v30, %v739_v24 }
  0xda   : > { %v709_v54 = vmax.f32 %v701_v49, 0.0  ;;  %v1336_v26 = vmov 0.0|0.0   ;;  %v1204_v51 = vpack.c.bf16 %v935_v13, %v934_v47  ;;  %v1338_v58 = vmov 0.0  }
  0xdb   : > { %v807_v4 = vadd.f32 %v799_v3, %v773_v35  ;;  %v809_v14 = vadd.f32 %v801_v48, %v775_v7  ;;  %v1192_v18 = vpack.c.bf16 %v821_v40, %v819_v60  ;;  %1200 = vmatprep.subr.bf16.mxu1 %v1336_v26  ;;  %1165 = vmatprep.mubr.msk.f32.mxu1 %vm1337_vm0, %v1338_v58 }
  0xdc   : > { %v1190_v41 = vpack.c.bf16 %v711_v10, %v709_v54 }
  0xdd   : > { %v817_v45 = vadd.f32 %v809_v14, %v1754_v53  ;;  %v815_v38 = vadd.f32 %v807_v4, %v1730_v5  ;;  %v829_v53 = vld [vmem:[%s1955_s3 + $0x18] sm:$0xff]  ;;  %v828_v5 = vld [vmem:[%s1955_s3 + $0x10] sm:$0xff] }
  0xdf   : > { %1187 = vmatpush1.bf16.xpose.msra.mxu0 %v1186_v43  ;;  %v825_v61 = vmax.f32 %v817_v45, 0.0  ;;  %v823_v20 = vmax.f32 %v815_v38, 0.0 }
  0xe0   : > { %1189 = vmatprep.subr.bf16.mxu0 %v1188_v15 }
  0xe1   : > { %v1196_v19 = vpack.c.bf16 %v825_v61, %v823_v20 }
  0xe7   : > { %1191 = vmatpush1.bf16.xpose.msra.mxu0 %v1190_v41 }
  0xe8   : > { %1193 = vmatprep.subr.bf16.mxu0 %v1192_v18 }
  0xef   : > { %1195 = vmatpush1.bf16.xpose.msra.mxu0 %v1829_v50  ;;  %v932_v50 = vld [vmem:[%s1956_s4] sm:$0xff] }
  0xf0   : > { %1197 = vmatprep.subr.bf16.mxu0 %v1196_v19  ;;  %v1201_v8 = vpack.c.bf16 %v933_v1, %v932_v50 }
  0xf2   : > { %1202 = vmatpush3.bf16.msra.mxu1 %v1201_v8 }
  0xf3   : > { %1203 = vmatprep.subr.bf16.mxu1 %v1336_v26 }
  0xf6   : > { %1205 = vmatpush3.bf16.msra.mxu1 %v1204_v51 }
  0xf7   : > { %1199 = vmatpush1.bf16.xpose.msra.mxu0 %v1198_v17 }
  0xfe   : > { %895 = vmatmul.mubr.f32.vlgmr.msra.gmra.mrb[0].mxu0 %v826_v12 }
  0xff   : > { %899 = vmatprep.mubr.f32.mxu0 %v829_v53 }
 0x102   : > { %900 = vmatmul.mubr.f32.gmra.mrb[2].mxu0 %v828_v5 }
 0x1d1   : > { %v896_v6 = vpop.f32.mrb[0].mxu0 }
 0x1d2   : > { %905 = vst [vmem:[%s294_s22] sm:$0xff] %v896_v6  ;;  %v898_v0 = vpop.f32.mrb[1].mxu0 }
 0x1d5   : > { %v901_v36 = vpop.f32.mrb[2].mxu0 }
 0x1d6   : > { %906 = vst [vmem:[%s294_s22 + $0x8] sm:$0xff] %v901_v36  ;;  %v907_v62 = vadd.f32 %v901_v36, %v896_v6  ;;  %v903_v31 = vpop.f32.mrb[3].mxu0  ;;  %s1047_s22 = sshll.u32 %s282_s21, 4  ;;  %s1912_s22 = int_to_ptr.vmem [resolvable:$true] %s1047_s22 }
 0x1d8   : > { %v908_v59 = vrot.slane %v907_v62, 4 }
 0x1da   : > { %v909_v16 = vadd.f32 %v908_v59, %v907_v62 }
 0x1dc   : > { %v910_v37 = vrot.slane %v909_v16, 2 }
 0x1de   : > { %v911_v44 = vadd.f32 %v910_v37, %v909_v16 }
 0x1e0   : > { %v912_v11 = vrot.slane %v911_v44, 1 }
 0x1e2   : > { %v913_v39 = vadd.f32 %v912_v11, %v911_v44 }
 0x1e4   : > { %v915_v63 = vmul.f32 0.0625, %v913_v39 }
 0x1e6   : > { %920 = vrot.lane.b32.xlu1 %v915_v63, %s1339_s13  ;;  %917 = vrot.lane.b32.xlu0 %v915_v63, %s1340_s14  ;;  %s1269_s13 = scalar_lea.vmem %s1912_s22, 64  ;;  %s1273_s14 = sshll.u32 %s1342_s28, 4  ;;  %s1274_s14 = int_to_ptr.vmem [resolvable:$false] %s1273_s14 }
 0x1e7   : > { %p1270_p12 = scmp.ne.s32.totalorder %s1912_s22, %s1269_s13  ;;  %p1276_p1 = scmp.lt.s32.totalorder %s1912_s22, %s1274_s14 }
 0x1e9   : > { %p1271_p13 = pnand %p1270_p12, %p1421_p5 }
 0x1ea   : > { %923 = vrot.lane.b32.xlu0 %v915_v63, %s1341_s15  ;;  %s1275_s15 = scalar_lea.vmem %s1274_s14, 128 }
 0x1eb   : > { %p1272_p0 = pneg %p1271_p13  ;;  %p1277_p2 = scmp.lt.s32.totalorder %s1275_s15, %s1269_s13 }
 0x1ed   : > { %p1278_p3 = por %p1277_p2, %p1276_p1 }
 0x1ef   : > { %p1279_p4 = pnand %p1278_p3, %p1272_p0 }
 0x258   : > { %v918_v34 = vpop.permute.xlu0 %917  ;;  %v921_v42 = vpop.permute.xlu1 %920 }
 0x259   : > { %v927_v56 = vsel %vm926_vm1, %v915_v63, %v918_v34 }
 0x25a   : > { %v929_v23 = vsel %vm928_vm2, %v927_v56, %v921_v42 }
 0x25c   : > { %v924_v57 = vpop.permute.xlu0 %923 }
 0x25d   : > { %v931_v17 = vsel %vm930_vm3, %v929_v23, %v924_v57 }
 0x25e   : > { %1166 = vmatmul.mubr.msk.f32.vlgmr.msra.gmra.mrb[0].mxu1 %vm943_vm4, %v931_v17 }
 0x331   : > { %v1013_v2 = vpop.f32.mrb[0].mxu1 }
 0x332   : > { %v1014_v28 = vadd.f32 %v1144_v32, %v1013_v2  ;;  %v1167_v22 = vpop.f32.mrb[1].mxu1 }
 0x334   : > { %v1017_v9 = vsub.f32 0.0, %v1014_v28 }
 0x336   : > { %v1018_v33 = vmul.f32 1.442695, %v1017_v9 }
 0x338   : > { %1265 = vpow2.f32 %v1018_v33 }
 0x342   : > { %v1266_v29 = vpop.eup %1265 }
 0x343   : > { %v1020_v27 = vadd.f32 1.0, %v1266_v29 }
 0x345   : > { %1267 = vrcp.f32 %v1020_v27 }
 0x34f   : > { %v1268_v46 = vpop.eup %1267 }
 0x350   : > { %1024 = vst.msk [vmem:[%s282_s21] sm:$0xf] %vm1023_vm5, %v1268_v46 }
 0x351   : > { %1282 = shalt.err (!%p1279_p4)
}
 0x352   : > { %s1283_s16 = scalar_lea.hbm %s1910_s8, 64  ;;  %s1287_s19 = scalar_lea.hbm %s1959_s7, 128 }
 0x353   : > { %p1284_p7 = scmp.ne.s32.totalorder %s1910_s8, %s1283_s16  ;;  %p1288_p10 = scmp.lt.u32.totalorder %s1910_s8, %s1959_s7 }
 0x354   : > { %p1289_p11 = scmp.lt.u32.totalorder %s1287_s19, %s1283_s16  ;;  %p1291_p13 = scmp.lt.u32.totalorder %s1283_s16, %s1910_s8 }
 0x355   : > { %p1285_p8 = pnand %p1284_p7, %p1421_p5 }
 0x356   : > { %p1290_p12 = por %p1289_p11, %p1288_p10 }
 0x357   : > { %p1286_p9 = pneg %p1285_p8 }
 0x358   : > { %p1292_p0 = por %p1291_p13, %p1290_p12 }
 0x35a   : > { %p1293_p1 = pnand %p1292_p0, %p1286_p9 }
 0x35c   : > { %1296 = shalt.err (!%p1293_p1)
}
 0x35d   : > { %1206 = dma.vmem_to_hbm [thread:$0]  (%p1421_p5), %s1912_s22, 64, %s1910_s8, %s1031_s9  }
 0x35e PF: > { %p1212_p2 = scmp.ge.s32.totalorder %s1331_s27, 2  ;;  %s1067_s23 = sand.u32 1, %s1319_s24  }
 0x35f   : > { %s1068_s29 = scalar_lea.sflag [#allocation3], %s1067_s23 }
 0x360   : > { %p1209_p3 = pnand %p1212_p2, %p1425_p6 }
 0x362   : > { %1314 = dma.done.wait (!%p1209_p3), %s1068_s29, 64  }
 0x363   : > { %1316 = vsyncadd (!%p1209_p3), %s1068_s29, 4294967232  ;;  %p18_p4 = scmp.ge.s32.totalorder %s1408_s30, 4   ;;  %s1980_s24 = smov %s1323_s25 }
 0x364   : > { %s1981_s25 = smov %s1327_s26  ;;  %s1982_s26 = smov %s1419_s10 }
 0x365   : > { %s1983_s27 = smov %s1408_s30  ;;  %20 = sbr.rel (!%p18_p4) target bundleno = 3 (0x3), region = 94 }
 0x36c   :  { %1073 = vsyncpa [#allocation3], 1 }
 0x36d   :  { %1075 = vsyncpa [#allocation3 + $0x1], 1 }

</bundles_post_ra>
